<compile_context>
chip_gen: v5e
topology: v5e:2x2
jax: 0.10.0
libtpu: 0.0.40
codegen_flags: <defaults>
</compile_context>

<pallas_src>
import functools

import jax
import jax.numpy as jnp
from jax import lax
from jax.experimental import pallas as pl
from jax.experimental.pallas import tpu as pltpu

IN_DIM = 512      # CLIP image-feature width (ViT-B/32)
OUT_DIM = 128     # projection width (lane-dense: multiple of 128)
MAX_ROW_TILE = 512  # cap so large batches pipeline + shard across TCs


def _round_up(x, m):
    return ((x + m - 1) // m) * m


# ----------------------------- Pallas kernel -------------------------------

def _embed_kernel(x_ref, w_ref, b_ref, o_ref):
    """Fused: y = x @ W + b ; out = y * rsqrt(max(||y||^2, eps^2))  per row."""
    x = x_ref[...]                                                    # [TB, IN_DIM]
    y = jnp.dot(x, w_ref[...], preferred_element_type=jnp.float32)   # MXU, f32 acc
    y = y + b_ref[...]                                                # [TB, OUT_DIM]

    # F.normalize(y, p=2, dim=-1) == y / max(||y||_2, 1e-12)
    sq = jnp.sum(y * y, axis=-1, keepdims=True)                       # [TB, 1]
    inv = lax.rsqrt(jnp.maximum(sq, 1e-24))                           # exact, single EUP op
    o_ref[...] = (y * inv).astype(o_ref.dtype)                        # lane-dense store


# ------------------------------- wrapper ------------------------------------

@functools.partial(jax.jit, static_argnames=("compute_dtype",))
def image_embedding_forward(clip_features, weight, bias, *, compute_dtype=jnp.float32):
    """Projection-head forward.

    clip_features: [B, IN_DIM]  frozen-CLIP image features
    weight:        [OUT_DIM, IN_DIM]  (PyTorch nn.Linear layout)
    bias:          [OUT_DIM]
    returns:       [B, OUT_DIM]  L2-normalized rows (float32)
    """
    B, d_in = clip_features.shape
    d_out = weight.shape[0]
    assert weight.shape == (d_out, d_in)
    assert d_in % 128 == 0 and d_out % 128 == 0

    x = clip_features.astype(compute_dtype)
    w = weight.T.astype(compute_dtype)          # (d_in, d_out): x @ W.T + b semantics
    b = bias.reshape(1, d_out).astype(jnp.float32)

    # Pick a row tile: whole (sublane-aligned) batch if small, else split into
    # near-equal tiles capped at MAX_ROW_TILE so large batches get >=2 grid steps.
    b8 = _round_up(B, 8)
    n_tiles = pl.cdiv(b8, MAX_ROW_TILE)
    row_tile = _round_up(pl.cdiv(b8, n_tiles), 8)
    b_pad = row_tile * n_tiles
    if b_pad != B:
        x = jnp.pad(x, ((0, b_pad - B), (0, 0)))   # zero rows -> finite output, sliced off

    out = pl.pallas_call(
        _embed_kernel,
        grid=(n_tiles,),
        in_specs=[
            pl.BlockSpec((row_tile, d_in), lambda i: (i, 0)),   # batch tile of features
            pl.BlockSpec((d_in, d_out), lambda i: (0, 0)),      # full weight, one DMA
            pl.BlockSpec((1, d_out), lambda i: (0, 0)),         # bias, one DMA
        ],
        out_specs=pl.BlockSpec((row_tile, d_out), lambda i: (i, 0)),
        out_shape=jax.ShapeDtypeStruct((b_pad, d_out), jnp.float32),
        compiler_params=pltpu.CompilerParams(
            dimension_semantics=("parallel",),   # shards batch tiles across v7x TCs
        ),
    )(x, w, b)
    return out[:B]


def init_params(key):
    kw, kb = jax.random.split(key)
    scale = 1.0 / jnp.sqrt(jnp.float32(IN_DIM))
    # PyTorch nn.Linear layout: weight (out_features, in_features), bias (out_features,)
    weight = scale * jax.random.normal(kw, (OUT_DIM, IN_DIM), dtype=jnp.float32)
    bias = scale * jax.random.normal(kb, (OUT_DIM,), dtype=jnp.float32)
    return weight, bias


# --------------------------------- main --------------------------------------

if __name__ == "__main__":
    key = jax.random.PRNGKey(0)
    kf, kp = jax.random.split(key)

    BATCH = 8
    # Stand-in for clip_model.get_image_features(**x) output (frozen backbone).
    clip_features = jax.random.normal(kf, (BATCH, IN_DIM), dtype=jnp.float32)
    weight, bias = init_params(kp)

    out = jax.block_until_ready(image_embedding_forward(clip_features, weight, bias))

    # Pure-JAX reference: x @ W.T + b, then L2 row-normalize (== F.normalize).
    ref = clip_features @ weight.T + bias
    ref = ref / jnp.maximum(jnp.linalg.norm(ref, axis=-1, keepdims=True), 1e-12)

    assert out.shape == (BATCH, OUT_DIM)
    assert bool(jnp.all(jnp.isfinite(out)))
    assert bool(jnp.max(jnp.abs(out - ref)) < 1e-4)
    row_norms = jnp.linalg.norm(out, axis=-1)
    assert bool(jnp.all(jnp.abs(row_norms - 1.0) < 1e-4))

    print("KERNEL_OK")
</pallas_src>

<mosaic_0001>
module attributes {stable_mosaic.version = 11 : i64} {
  func.func @_embed_kernel(%arg0: i32, %arg1: memref<8x512xf32, #tpu.memory_space<vmem>>, %arg2: memref<512x128xf32, #tpu.memory_space<vmem>>, %arg3: memref<1x128xf32, #tpu.memory_space<vmem>>, %arg4: memref<8x128xf32, #tpu.memory_space<vmem>>) attributes {dimension_semantics = [#tpu.dimension_semantics<parallel>], iteration_bounds = array<i64: 1>, scalar_prefetch = 0 : i64, scratch_operands = 0 : i64, tpu.core_type = #tpu.core_type<tc>, window_params = [{transform_indices = @transform_0, window_bounds = array<i64: 8, 512>}, {pipeline_mode = #tpu.pipeline_mode<synchronous>, transform_indices = @transform_1, window_bounds = array<i64: 512, 128>}, {pipeline_mode = #tpu.pipeline_mode<synchronous>, transform_indices = @transform_2, window_bounds = array<i64: 1, 128>}, {transform_indices = @transform_3, window_bounds = array<i64: 8, 128>}]} {
    %c0 = arith.constant 0 : index
    %c0_0 = arith.constant 0 : index
    %0 = vector.load %arg1[%c0, %c0_0] : memref<8x512xf32, #tpu.memory_space<vmem>>, vector<8x512xf32>
    %c0_1 = arith.constant 0 : index
    %c0_2 = arith.constant 0 : index
    %1 = vector.load %arg2[%c0_1, %c0_2] : memref<512x128xf32, #tpu.memory_space<vmem>>, vector<512x128xf32>
    %cst = arith.constant dense<0.000000e+00> : vector<8x128xf32>
    %2 = tpu.matmul %0, %1, %cst {dimension_numbers = #tpu.dot_dimension_numbers<[1], [0], [0], [1], [0, 0, 1, 1], [], []>} : vector<8x512xf32>, vector<512x128xf32>, vector<8x128xf32> -> vector<8x128xf32>
    %c0_3 = arith.constant 0 : index
    %c0_4 = arith.constant 0 : index
    %3 = vector.load %arg3[%c0_3, %c0_4] : memref<1x128xf32, #tpu.memory_space<vmem>>, vector<1x128xf32>
    %4 = vector.broadcast %3 : vector<1x128xf32> to vector<8x128xf32>
    %5 = arith.addf %2, %4 : vector<8x128xf32>
    %6 = arith.mulf %5, %5 : vector<8x128xf32>
    %cst_5 = arith.constant dense<0.000000e+00> : vector<8xf32>
    %7 = vector.multi_reduction <add>, %6, %cst_5 [1] : vector<8x128xf32> to vector<8xf32>
    %8 = vector.shape_cast %7 : vector<8xf32> to vector<8x1xf32>
    %cst_6 = arith.constant 1.000000e-24 : f32
    %9 = vector.broadcast %cst_6 : f32 to vector<8x1xf32>
    %10 = arith.maximumf %8, %9 : vector<8x1xf32>
    %11 = math.rsqrt %10 : vector<8x1xf32>
    %12 = vector.broadcast %11 : vector<8x1xf32> to vector<8x128xf32>
    %13 = arith.mulf %5, %12 : vector<8x128xf32>
    %c0_7 = arith.constant 0 : index
    %c0_8 = arith.constant 0 : index
    %14 = vector.load %arg4[%c0_7, %c0_8] : memref<8x128xf32, #tpu.memory_space<vmem>>, vector<8x128xf32>
    tpu.vector_store %arg4[%c0_7, %c0_8], %13 {strides = array<i32>} : memref<8x128xf32, #tpu.memory_space<vmem>>, vector<8x128xf32>,
    return
  }
  func.func @transform_0(%arg0: i32) -> (i32, i32) {
    %c0_i32 = arith.constant 0 : i32
    %c0_i32_0 = arith.constant 0 : i32
    return %arg0, %c0_i32 : i32, i32
  }
  func.func @transform_1(%arg0: i32) -> (i32, i32) {
    %c0_i32 = arith.constant 0 : i32
    %c0_i32_0 = arith.constant 0 : i32
    %c0_i32_1 = arith.constant 0 : i32
    return %c0_i32, %c0_i32_0 : i32, i32
  }
  func.func @transform_2(%arg0: i32) -> (i32, i32) {
    %c0_i32 = arith.constant 0 : i32
    %c0_i32_0 = arith.constant 0 : i32
    %c0_i32_1 = arith.constant 0 : i32
    return %c0_i32, %c0_i32_0 : i32, i32
  }
  func.func @transform_3(%arg0: i32) -> (i32, i32) {
    %c0_i32 = arith.constant 0 : i32
    %c0_i32_0 = arith.constant 0 : i32
    return %arg0, %c0_i32 : i32, i32
  }
}

</mosaic_0001>

<bundles_post_ra>
// kernel: image_embedding_forward.1
= control target key start
LH: loop header
LB: loop body
LE: loop exit
PB: predicated region body
PF: predicated region fallthrough
CT: control target
= control target key end

     0   :  { %s460_s0 = inlined_call_operand.vmem [shape: f32[8,512], index: 0, kind: input, shape index: {}]   ;;  %s461_s1 = inlined_call_operand.vmem [shape: f32[512,128], index: 1, kind: input, shape index: {}]   ;;  %s462_s2 = inlined_call_operand.vmem [shape: f32[1,128], index: 2, kind: input, shape index: {}]   ;;  %s463_s3 = inlined_call_operand.hbm [shape: f32[8,128], index: 3, kind: output, shape index: {}]  }
   0x1   :  { %v66_v0 = vld [vmem:[%s461_s1 + $0x178] sm:$0xff]  ;;  %v65_v2 = vld [vmem:[%s461_s1 + $0x170] sm:$0xff]  ;;  %v64_v6 = vld [vmem:[%s461_s1 + $0x168] sm:$0xff] }
   0x2   :  { %v34_v1 = vld [vmem:[%s461_s1 + $0x78] sm:$0xff]  ;;  %127 = vmatpush.msra.mxu2 %v66_v0  ;;  %v33_v4 = vld [vmem:[%s461_s1 + $0x70] sm:$0xff]  ;;  %v32_v8 = vld [vmem:[%s461_s1 + $0x68] sm:$0xff] }
   0x3   :  { %87 = vmatpush.msra.mxu0 %v34_v1  ;;  %v82_v3 = vld [vmem:[%s461_s1 + $0x1f8] sm:$0xff]  ;;  %v81_v7 = vld [vmem:[%s461_s1 + $0x1f0] sm:$0xff]  ;;  %v80_v10 = vld [vmem:[%s461_s1 + $0x1e8] sm:$0xff] }
   0x4   :  { %v50_v5 = vld [vmem:[%s461_s1 + $0xf8] sm:$0xff]  ;;  %147 = vmatpush.msra.mxu3 %v82_v3  ;;  %128 = vmatpush.msra.mxu2 %v65_v2  ;;  %v49_v9 = vld [vmem:[%s461_s1 + $0xf0] sm:$0xff]  ;;  %v63_v11 = vld [vmem:[%s461_s1 + $0x160] sm:$0xff] }
   0x5   :  { %107 = vmatpush.msra.mxu1 %v50_v5  ;;  %88 = vmatpush.msra.mxu0 %v33_v4  ;;  %v31_v12 = vld [vmem:[%s461_s1 + $0x60] sm:$0xff]  ;;  %v48_v13 = vld [vmem:[%s461_s1 + $0xe8] sm:$0xff]  ;;  %v62_v16 = vld [vmem:[%s461_s1 + $0x158] sm:$0xff] }
   0x6   :  { %148 = vmatpush.msra.mxu3 %v81_v7  ;;  %129 = vmatpush.msra.mxu2 %v64_v6  ;;  %v79_v14 = vld [vmem:[%s461_s1 + $0x1e0] sm:$0xff]  ;;  %v30_v17 = vld [vmem:[%s461_s1 + $0x58] sm:$0xff]  ;;  %v61_v20 = vld [vmem:[%s461_s1 + $0x150] sm:$0xff] }
   0x7   :  { %108 = vmatpush.msra.mxu1 %v49_v9  ;;  %89 = vmatpush.msra.mxu0 %v32_v8  ;;  %v47_v15 = vld [vmem:[%s461_s1 + $0xe0] sm:$0xff]  ;;  %v78_v18 = vld [vmem:[%s461_s1 + $0x1d8] sm:$0xff]  ;;  %v29_v21 = vld [vmem:[%s461_s1 + $0x50] sm:$0xff] }
   0x8   :  { %149 = vmatpush.msra.mxu3 %v80_v10  ;;  %130 = vmatpush.msra.mxu2 %v63_v11  ;;  %v46_v19 = vld [vmem:[%s461_s1 + $0xd8] sm:$0xff]  ;;  %v77_v22 = vld [vmem:[%s461_s1 + $0x1d0] sm:$0xff]  ;;  %v60_v24 = vld [vmem:[%s461_s1 + $0x148] sm:$0xff] }
   0x9   :  { %109 = vmatpush.msra.mxu1 %v48_v13  ;;  %90 = vmatpush.msra.mxu0 %v31_v12  ;;  %v45_v23 = vld [vmem:[%s461_s1 + $0xd0] sm:$0xff]  ;;  %v28_v25 = vld [vmem:[%s461_s1 + $0x48] sm:$0xff]  ;;  %v59_v28 = vld [vmem:[%s461_s1 + $0x140] sm:$0xff] }
   0xa   :  { %150 = vmatpush.msra.mxu3 %v79_v14  ;;  %131 = vmatpush.msra.mxu2 %v62_v16  ;;  %v76_v26 = vld [vmem:[%s461_s1 + $0x1c8] sm:$0xff]  ;;  %v27_v29 = vld [vmem:[%s461_s1 + $0x40] sm:$0xff]  ;;  %v58_v32 = vld [vmem:[%s461_s1 + $0x138] sm:$0xff] }
   0xb   :  { %110 = vmatpush.msra.mxu1 %v47_v15  ;;  %91 = vmatpush.msra.mxu0 %v30_v17  ;;  %v44_v27 = vld [vmem:[%s461_s1 + $0xc8] sm:$0xff]  ;;  %v75_v30 = vld [vmem:[%s461_s1 + $0x1c0] sm:$0xff]  ;;  %v26_v33 = vld [vmem:[%s461_s1 + $0x38] sm:$0xff] }
   0xc   :  { %151 = vmatpush.msra.mxu3 %v78_v18  ;;  %132 = vmatpush.msra.mxu2 %v61_v20  ;;  %v43_v31 = vld [vmem:[%s461_s1 + $0xc0] sm:$0xff]  ;;  %v74_v34 = vld [vmem:[%s461_s1 + $0x1b8] sm:$0xff]  ;;  %v57_v36 = vld [vmem:[%s461_s1 + $0x130] sm:$0xff] }
   0xd   :  { %111 = vmatpush.msra.mxu1 %v46_v19  ;;  %92 = vmatpush.msra.mxu0 %v29_v21  ;;  %v42_v35 = vld [vmem:[%s461_s1 + $0xb8] sm:$0xff]  ;;  %v25_v37 = vld [vmem:[%s461_s1 + $0x30] sm:$0xff]  ;;  %v56_v40 = vld [vmem:[%s461_s1 + $0x128] sm:$0xff] }
   0xe   :  { %152 = vmatpush.msra.mxu3 %v77_v22  ;;  %133 = vmatpush.msra.mxu2 %v60_v24  ;;  %v73_v38 = vld [vmem:[%s461_s1 + $0x1b0] sm:$0xff]  ;;  %v24_v41 = vld [vmem:[%s461_s1 + $0x28] sm:$0xff]  ;;  %v55_v44 = vld [vmem:[%s461_s1 + $0x120] sm:$0xff] }
   0xf   :  { %112 = vmatpush.msra.mxu1 %v45_v23  ;;  %93 = vmatpush.msra.mxu0 %v28_v25  ;;  %v41_v39 = vld [vmem:[%s461_s1 + $0xb0] sm:$0xff]  ;;  %v72_v42 = vld [vmem:[%s461_s1 + $0x1a8] sm:$0xff]  ;;  %v23_v45 = vld [vmem:[%s461_s1 + $0x20] sm:$0xff] }
  0x10   :  { %153 = vmatpush.msra.mxu3 %v76_v26  ;;  %134 = vmatpush.msra.mxu2 %v59_v28  ;;  %v40_v43 = vld [vmem:[%s461_s1 + $0xa8] sm:$0xff]  ;;  %v71_v46 = vld [vmem:[%s461_s1 + $0x1a0] sm:$0xff]  ;;  %v54_v48 = vld [vmem:[%s461_s1 + $0x118] sm:$0xff] }
  0x11   :  { %113 = vmatpush.msra.mxu1 %v44_v27  ;;  %94 = vmatpush.msra.mxu0 %v27_v29  ;;  %v39_v47 = vld [vmem:[%s461_s1 + $0xa0] sm:$0xff]  ;;  %v22_v49 = vld [vmem:[%s461_s1 + $0x18] sm:$0xff] }
  0x12   :  { %154 = vmatpush.msra.mxu3 %v75_v30  ;;  %135 = vmatpush.msra.mxu2 %v58_v32  ;;  %v70_v50 = vld [vmem:[%s461_s1 + $0x198] sm:$0xff] }
  0x13   :  { %114 = vmatpush.msra.mxu1 %v43_v31  ;;  %95 = vmatpush.msra.mxu0 %v26_v33  ;;  %v38_v51 = vld [vmem:[%s461_s1 + $0x98] sm:$0xff] }
  0x14   :  { %155 = vmatpush.msra.mxu3 %v74_v34  ;;  %136 = vmatpush.msra.mxu2 %v57_v36 }
  0x15   :  { %115 = vmatpush.msra.mxu1 %v42_v35  ;;  %96 = vmatpush.msra.mxu0 %v25_v37 }
  0x16   :  { %156 = vmatpush.msra.mxu3 %v73_v38  ;;  %137 = vmatpush.msra.mxu2 %v56_v40 }
  0x17   :  { %116 = vmatpush.msra.mxu1 %v41_v39  ;;  %97 = vmatpush.msra.mxu0 %v24_v41 }
  0x18   :  { %157 = vmatpush.msra.mxu3 %v72_v42  ;;  %138 = vmatpush.msra.mxu2 %v55_v44 }
  0x19   :  { %117 = vmatpush.msra.mxu1 %v40_v43  ;;  %98 = vmatpush.msra.mxu0 %v23_v45 }
  0x1a   :  { %8 = vsyncpa [#allocation3], 0  ;;  %158 = vmatpush.msra.mxu3 %v71_v46  ;;  %v53_v52 = vld [vmem:[%s461_s1 + $0x110] sm:$0xff]  ;;  %139 = vmatpush.msra.mxu2 %v54_v48  ;;  %v52_v56 = vld [vmem:[%s461_s1 + $0x108] sm:$0xff]  ;;  %s190_s16 = sshll.u32 %s463_s3, 4  ;;  %s191_s16 = int_to_ptr.hbm [resolvable:$true] %s190_s16 }
  0x1b   :  { %118 = vmatpush.msra.mxu1 %v39_v47  ;;  %v21_v53 = vld [vmem:[%s461_s1 + $0x10] sm:$0xff]  ;;  %99 = vmatpush.msra.mxu0 %v22_v49  ;;  %v20_v57 = vld [vmem:[%s461_s1 + $0x8] sm:$0xff]  ;;  %v51_v60 = vld [vmem:[%s461_s1 + $0x100] sm:$0xff] }
  0x1c   :  { %v69_v54 = vld [vmem:[%s461_s1 + $0x190] sm:$0xff]  ;;  %159 = vmatpush.msra.mxu3 %v70_v50  ;;  %140 = vmatpush.msra.mxu2 %v53_v52  ;;  %v68_v58 = vld [vmem:[%s461_s1 + $0x188] sm:$0xff]  ;;  %v19_v61 = vld [vmem:[%s461_s1] sm:$0xff] }
  0x1d   :  { %v37_v55 = vld [vmem:[%s461_s1 + $0x90] sm:$0xff]  ;;  %119 = vmatpush.msra.mxu1 %v38_v51  ;;  %100 = vmatpush.msra.mxu0 %v21_v53  ;;  %v36_v59 = vld [vmem:[%s461_s1 + $0x88] sm:$0xff]  ;;  %v67_v63 = vld [vmem:[%s461_s1 + $0x180] sm:$0xff] }
  0x1e   :  { %160 = vmatpush.msra.mxu3 %v69_v54  ;;  %141 = vmatpush.msra.mxu2 %v52_v56  ;;  %v17_v62 = vld [vmem:[%s460_s0 + $0x10] sm:$0xff]  ;;  %v15_v0 = vld [vmem:[%s460_s0] sm:$0xff]  ;;  %v18_v1 = vld [vmem:[%s460_s0 + $0x18] sm:$0xff] }
  0x1f   :  { %120 = vmatpush.msra.mxu1 %v37_v55  ;;  %101 = vmatpush.msra.mxu0 %v20_v57  ;;  %v35_v2 = vld [vmem:[%s461_s1 + $0x80] sm:$0xff]  ;;  %v16_v3 = vld [vmem:[%s460_s0 + $0x8] sm:$0xff]  ;;  %s229_s0 = smov [#allocation2]  }
  0x20   :  { %161 = vmatpush.msra.mxu3 %v68_v58  ;;  %142 = vmatpush.msra.mxu2 %v51_v60  ;;  %v200_v4 = vld [vmem:[%s462_s2] ss:$0 sm:$0xff]  ;;  %s188_s1 = sshll.u32 %s229_s0, 4  ;;  %s189_s1 = int_to_ptr.vmem [resolvable:$true] %s188_s1 }
  0x21   :  { %121 = vmatpush.msra.mxu1 %v36_v59  ;;  %102 = vmatpush.msra.mxu0 %v19_v61 }
  0x22   :  { %143 = vmatmul.f32.vlgmr.msra.gmra.mxu2 %v17_v62  ;;  %162 = vmatpush.msra.mxu3 %v67_v63 }
  0x23   :  { %103 = vmatmul.f32.vlgmr.msra.gmra.mxu0 %v15_v0  ;;  %163 = vmatmul.f32.vlgmr.msra.gmra.mxu3 %v18_v1 }
  0x24   :  { %122 = vmatpush.msra.mxu1 %v35_v2 }
  0x25   :  { %123 = vmatmul.f32.vlgmr.msra.gmra.mxu1 %v16_v3 }
  0xa0   :  { %v104_v5 = vpop.f32.mrf.mxu0 }
  0xa1   :  { %v105_v6 = vadd.f32 %v200_v4, %v104_v5 }
  0xa2   :  { %v124_v7 = vpop.f32.mrf.mxu1 }
  0xa3   :  { %v125_v8 = vadd.f32 %v124_v7, %v105_v6 }
  0xa5   :  { %v144_v9 = vpop.f32.mrf.mxu2 }
  0xa6   :  { %v145_v10 = vadd.f32 %v144_v9, %v125_v8  ;;  %v164_v11 = vpop.f32.mrf.mxu3 }
  0xa8   :  { %v165_v12 = vadd.f32 %v164_v11, %v145_v10 }
  0xaa   :  { %v167_v13 = vmul.f32 %v165_v12, %v165_v12 }
  0xac   :  { %168 = vadd.xlane.f32.xlu0 %v167_v13 }
 0x11f   :  { %v169_v14 = vpop.xlane.xlu0 %168 }
 0x120   :  { %v170_v15 = vmax.f32 %v169_v14, 1e-24 }
 0x122   :  { %201 = vrsqrt.f32 %v170_v15  ;;  %vm177_vm1 = vweird.f32 %v170_v15 }
 0x128   :  { %v202_v16 = vpop.eup %201 }
 0x129   :  { %v172_v17 = vmul.f32 %v202_v16, %v170_v15  ;;  %vm178_vm0 = vweird.f32 %v202_v16 }
 0x12a   :  { %vm179_vm2 = vmor %vm177_vm1, %vm178_vm0 }
 0x12b   :  { %v173_v18 = vmul.f32 %v202_v16, %v172_v17 }
 0x12d   :  { %v174_v19 = vmul.f32 0.5, %v173_v18 }
 0x12f   :  { %v175_v20 = vsub.f32 1.5, %v174_v19 }
 0x131   :  { %v176_v21 = vmul.f32 %v202_v16, %v175_v20 }
 0x133   :  { %v180_v22 = vsel %vm179_vm2, %v202_v16, %v176_v21 }
 0x134   :  { %v181_v23 = vmul.f32 %v180_v22, %v165_v12 }
 0x136   :  { %182 = vst [vmem:[#allocation2] sm:$0xff] %v181_v23 }
 0x137   :  { %193 = dma.vmem_to_hbm [thread:$0]  %s189_s1, 128, %s191_s16, [#allocation3]  }
 0x138   :  { %227 = dma.done.wait [#allocation3], 128  }
 0x139   :  { %228 = vsyncadd [#allocation3], 4294967168 }
 0x13a   :  { %198 = vsyncpa [#allocation3], 1 }

</bundles_post_ra>
